<compile_context>
chip_gen: v7x
topology: tpu7x:2x2x1
jax: 0.10.0
libtpu: 0.0.40
codegen_flags: <defaults>
</compile_context>

<pallas_src>
import jax
import jax.numpy as jnp
from jax.experimental import pallas as pl
from jax.experimental.pallas import tpu as pltpu


def _round_up(x, m):
    return ((x + m - 1) // m) * m


def _elu(x):
    # ELU(alpha=1): x if x > 0 else exp(x) - 1.
    # min() keeps the unselected exp branch finite; exp issues on the EUP slot.
    return jnp.where(x > 0, x, jnp.exp(jnp.minimum(x, 0.0)) - 1.0)


def _make_cbf_kernel(num_linear, feat_dim):
    """Build a kernel for `num_linear` Linear layers (last one is the CBF layer)."""

    def kernel(*refs):
        obs_ref, sf_ref = refs[0], refs[1]
        out_ref = refs[-1]

        h = obs_ref[...]
        for li in range(num_linear):
            w_ref = refs[2 + 2 * li]
            b_ref = refs[3 + 2 * li]
            # bf16 operands feed the MXU natively; accumulate in f32.
            h = jnp.dot(h.astype(jnp.bfloat16), w_ref[...],
                        preferred_element_type=jnp.float32) + b_ref[...]
            if li < num_linear - 1:
                h = _elu(h)  # Dropout == identity in eval mode

        # h is w_cbf padded to a lane-dense width; padded columns are exactly 0
        # (zero-padded weight columns + zero-padded bias), and state_features is
        # zero-padded the same way, so the full-lane reduction equals the true sum.
        w_cbf = h
        rho = jnp.sum(w_cbf * sf_ref[...], axis=-1, keepdims=True)
        rho = pl.reciprocal(1.0 + jnp.exp(-rho), approx=True)  # sigmoid via EUP

        # Pack rho into column `feat_dim` of the same lane-dense slab so the store
        # is a single unmasked, full-width vector store.
        lane = jax.lax.broadcasted_iota(jnp.int32, w_cbf.shape, 1)
        out_ref[...] = jnp.where(lane == feat_dim, rho, w_cbf).astype(out_ref.dtype)

    return kernel


def deep_risk_cbf_forward(observation, state_features, params, *, max_tile_b=1024):
    """rho, w_cbf = forward(observation, state_features) with a single pallas_call.

    params: list of (w, b) with w[in, out] (pre-transposed from torch's [out, in])
            and b[1, out].
    """
    B, num_obs = observation.shape
    F = state_features.shape[1]
    num_linear = len(params)

    out_pad = _round_up(F + 1, 128)              # lane-dense packed output width
    tile_b = min(max_tile_b, _round_up(B, 8))    # batch tile (multiple of 8 sublanes)
    b_pad = _round_up(B, tile_b)

    def _const_spec(shape):
        return pl.BlockSpec(shape, lambda i: (0, 0))   # VMEM-resident across tiles

    # Weights -> bf16 once; final layer (and its bias) zero-padded to out_pad lanes.
    flat_args, flat_specs = [], []
    for li, (w, b) in enumerate(params):
        w = w.astype(jnp.bfloat16)
        b = b.astype(jnp.float32)
        if li == num_linear - 1:
            w = jnp.pad(w, ((0, 0), (0, out_pad - F)))
            b = jnp.pad(b, ((0, 0), (0, out_pad - F)))
        flat_args += [w, b]
        flat_specs += [_const_spec(w.shape), _const_spec(b.shape)]

    obs_p = jnp.pad(observation.astype(jnp.float32), ((0, b_pad - B), (0, 0)))
    sf_p = jnp.pad(state_features.astype(jnp.float32),
                   ((0, b_pad - B), (0, out_pad - F)))

    obs_spec = pl.BlockSpec((tile_b, num_obs), lambda i: (i, 0))
    sf_spec = pl.BlockSpec((tile_b, out_pad), lambda i: (i, 0))
    out_spec = pl.BlockSpec((tile_b, out_pad), lambda i: (i, 0))

    # Advisory cost estimate so XLA schedules surrounding ops sensibly.
    flops = 2 * b_pad * sum(w.shape[0] * w.shape[1] for w, _ in params[:-1])
    flops += 2 * b_pad * params[-1][0].shape[0] * out_pad
    flops += 6 * b_pad * out_pad  # elementwise epilogue
    transcendentals = b_pad * (sum(w.shape[1] for w, _ in params[:-1]) + 2)
    bytes_accessed = (obs_p.size * 4 + sf_p.size * 4 + b_pad * out_pad * 4
                      + sum(int(a.size) * a.dtype.itemsize for a in flat_args))
    cost = pl.CostEstimate(flops=int(flops),
                           transcendentals=int(transcendentals),
                           bytes_accessed=int(bytes_accessed))

    out = pl.pallas_call(
        _make_cbf_kernel(num_linear, F),
        out_shape=jax.ShapeDtypeStruct((b_pad, out_pad), jnp.float32),
        grid=(b_pad // tile_b,),
        in_specs=[obs_spec, sf_spec] + flat_specs,
        out_specs=out_spec,
        compiler_params=pltpu.CompilerParams(
            dimension_semantics=("parallel",)),   # 2 TCs on v7x; no-op on v5e/v6e
        cost_estimate=cost,
    )(obs_p, sf_p, *flat_args)

    w_cbf = out[:B, :F]
    rho = out[:B, F:F + 1]
    return rho, w_cbf


def init_params(key, num_obs_inputs, num_state_features, num_neurons):
    """Mimic torch.nn.Linear's U(-1/sqrt(fan_in), 1/sqrt(fan_in)) init.

    Weights stored pre-transposed as [in, out] so the kernel does x @ W directly.
    """
    dims = [num_obs_inputs] + list(num_neurons) + [num_state_features]
    params = []
    for i in range(len(dims) - 1):
        fan_in, fan_out = dims[i], dims[i + 1]
        key, kw, kb = jax.random.split(key, 3)
        bound = 1.0 / jnp.sqrt(jnp.float32(fan_in))
        w = jax.random.uniform(kw, (fan_in, fan_out), jnp.float32, -bound, bound)
        b = jax.random.uniform(kb, (1, fan_out), jnp.float32, -bound, bound)
        params.append((w, b))
    return params


def reference_forward(observation, state_features, params):
    """Pure-JAX f32 reference of the PyTorch forward (eval mode)."""
    x = observation
    for li, (w, b) in enumerate(params):
        x = x @ w + b
        if li < len(params) - 1:
            x = _elu(x)
    w_cbf = x
    rho = jax.nn.sigmoid(jnp.sum(w_cbf * state_features, axis=-1, keepdims=True))
    return rho, w_cbf


if __name__ == "__main__":
    # Small shapes consistent with the module's constructor.
    batch = 8
    num_obs_inputs = 16
    num_state_features = 8
    num_neurons = [32, 32]

    key = jax.random.PRNGKey(0)
    key, k_obs, k_sf, k_p = jax.random.split(key, 4)

    observation = jax.random.normal(k_obs, (batch, num_obs_inputs), jnp.float32)
    state_features = jax.random.normal(k_sf, (batch, num_state_features), jnp.float32)
    params = init_params(k_p, num_obs_inputs, num_state_features, num_neurons)

    rho, w_cbf = deep_risk_cbf_forward(observation, state_features, params)
    jax.block_until_ready((rho, w_cbf))

    rho_ref, w_cbf_ref = reference_forward(observation, state_features, params)
    assert rho.shape == (batch, 1) and w_cbf.shape == (batch, num_state_features)
    # bf16 MXU operands + approx-reciprocal sigmoid -> loosened tolerance vs f32 ref.
    assert jnp.allclose(w_cbf, w_cbf_ref, atol=3e-2, rtol=3e-2), "w_cbf mismatch"
    assert jnp.allclose(rho, rho_ref, atol=3e-2, rtol=3e-2), "rho mismatch"

    print("KERNEL_OK")
</pallas_src>

<mosaic_0001>
module attributes {stable_mosaic.version = 11 : i64} {
  func.func @kernel(%arg0: i32, %arg1: memref<8x16xf32, #tpu.memory_space<vmem>>, %arg2: memref<8x128xf32, #tpu.memory_space<vmem>>, %arg3: memref<16x32xbf16, #tpu.memory_space<vmem>>, %arg4: memref<1x32xf32, #tpu.memory_space<vmem>>, %arg5: memref<32x32xbf16, #tpu.memory_space<vmem>>, %arg6: memref<1x32xf32, #tpu.memory_space<vmem>>, %arg7: memref<32x128xbf16, #tpu.memory_space<vmem>>, %arg8: memref<1x128xf32, #tpu.memory_space<vmem>>, %arg9: memref<8x128xf32, #tpu.memory_space<vmem>>) attributes {dimension_semantics = [#tpu.dimension_semantics<parallel>], iteration_bounds = array<i64: 1>, scalar_prefetch = 0 : i64, scratch_operands = 0 : i64, tpu.core_type = #tpu.core_type<tc>, window_params = [{transform_indices = @transform_0, window_bounds = array<i64: 8, 16>}, {transform_indices = @transform_1, window_bounds = array<i64: 8, 128>}, {pipeline_mode = #tpu.pipeline_mode<synchronous>, transform_indices = @transform_2, window_bounds = array<i64: 16, 32>}, {pipeline_mode = #tpu.pipeline_mode<synchronous>, transform_indices = @transform_3, window_bounds = array<i64: 1, 32>}, {pipeline_mode = #tpu.pipeline_mode<synchronous>, transform_indices = @transform_4, window_bounds = array<i64: 32, 32>}, {pipeline_mode = #tpu.pipeline_mode<synchronous>, transform_indices = @transform_5, window_bounds = array<i64: 1, 32>}, {pipeline_mode = #tpu.pipeline_mode<synchronous>, transform_indices = @transform_6, window_bounds = array<i64: 32, 128>}, {pipeline_mode = #tpu.pipeline_mode<synchronous>, transform_indices = @transform_7, window_bounds = array<i64: 1, 128>}, {transform_indices = @transform_8, window_bounds = array<i64: 8, 128>}]} {
    %c0 = arith.constant 0 : index
    %c0_0 = arith.constant 0 : index
    %0 = vector.load %arg1[%c0, %c0_0] : memref<8x16xf32, #tpu.memory_space<vmem>>, vector<8x16xf32>
    %1 = arith.truncf %0 : vector<8x16xf32> to vector<8x16xbf16>
    %c0_1 = arith.constant 0 : index
    %c0_2 = arith.constant 0 : index
    %2 = vector.load %arg3[%c0_1, %c0_2] : memref<16x32xbf16, #tpu.memory_space<vmem>>, vector<16x32xbf16>
    %cst = arith.constant dense<0.000000e+00> : vector<8x32xf32>
    %3 = tpu.matmul %1, %2, %cst {dimension_numbers = #tpu.dot_dimension_numbers<[1], [0], [0], [1], [0, 0, 1, 1], [], []>} : vector<8x16xbf16>, vector<16x32xbf16>, vector<8x32xf32> -> vector<8x32xf32>
    %c0_3 = arith.constant 0 : index
    %c0_4 = arith.constant 0 : index
    %4 = vector.load %arg4[%c0_3, %c0_4] : memref<1x32xf32, #tpu.memory_space<vmem>>, vector<1x32xf32>
    %5 = vector.broadcast %4 : vector<1x32xf32> to vector<8x32xf32>
    %6 = arith.addf %3, %5 : vector<8x32xf32>
    %cst_5 = arith.constant 0.000000e+00 : f32
    %7 = vector.broadcast %cst_5 : f32 to vector<8x32xf32>
    %8 = arith.cmpf ogt, %6, %7 : vector<8x32xf32>
    %cst_6 = arith.constant 0.000000e+00 : f32
    %9 = vector.broadcast %cst_6 : f32 to vector<8x32xf32>
    %10 = arith.minimumf %6, %9 : vector<8x32xf32>
    %11 = math.exp %10 : vector<8x32xf32>
    %cst_7 = arith.constant 1.000000e+00 : f32
    %12 = vector.broadcast %cst_7 : f32 to vector<8x32xf32>
    %13 = arith.subf %11, %12 : vector<8x32xf32>
    %14 = arith.select %8, %6, %13 : vector<8x32xi1>, vector<8x32xf32>
    %15 = arith.truncf %14 : vector<8x32xf32> to vector<8x32xbf16>
    %c0_8 = arith.constant 0 : index
    %c0_9 = arith.constant 0 : index
    %16 = vector.load %arg5[%c0_8, %c0_9] : memref<32x32xbf16, #tpu.memory_space<vmem>>, vector<32x32xbf16>
    %cst_10 = arith.constant dense<0.000000e+00> : vector<8x32xf32>
    %17 = tpu.matmul %15, %16, %cst_10 {dimension_numbers = #tpu.dot_dimension_numbers<[1], [0], [0], [1], [0, 0, 1, 1], [], []>} : vector<8x32xbf16>, vector<32x32xbf16>, vector<8x32xf32> -> vector<8x32xf32>
    %c0_11 = arith.constant 0 : index
    %c0_12 = arith.constant 0 : index
    %18 = vector.load %arg6[%c0_11, %c0_12] : memref<1x32xf32, #tpu.memory_space<vmem>>, vector<1x32xf32>
    %19 = vector.broadcast %18 : vector<1x32xf32> to vector<8x32xf32>
    %20 = arith.addf %17, %19 : vector<8x32xf32>
    %cst_13 = arith.constant 0.000000e+00 : f32
    %21 = vector.broadcast %cst_13 : f32 to vector<8x32xf32>
    %22 = arith.cmpf ogt, %20, %21 : vector<8x32xf32>
    %cst_14 = arith.constant 0.000000e+00 : f32
    %23 = vector.broadcast %cst_14 : f32 to vector<8x32xf32>
    %24 = arith.minimumf %20, %23 : vector<8x32xf32>
    %25 = math.exp %24 : vector<8x32xf32>
    %cst_15 = arith.constant 1.000000e+00 : f32
    %26 = vector.broadcast %cst_15 : f32 to vector<8x32xf32>
    %27 = arith.subf %25, %26 : vector<8x32xf32>
    %28 = arith.select %22, %20, %27 : vector<8x32xi1>, vector<8x32xf32>
    %29 = arith.truncf %28 : vector<8x32xf32> to vector<8x32xbf16>
    %c0_16 = arith.constant 0 : index
    %c0_17 = arith.constant 0 : index
    %30 = vector.load %arg7[%c0_16, %c0_17] : memref<32x128xbf16, #tpu.memory_space<vmem>>, vector<32x128xbf16>
    %cst_18 = arith.constant dense<0.000000e+00> : vector<8x128xf32>
    %31 = tpu.matmul %29, %30, %cst_18 {dimension_numbers = #tpu.dot_dimension_numbers<[1], [0], [0], [1], [0, 0, 1, 1], [], []>} : vector<8x32xbf16>, vector<32x128xbf16>, vector<8x128xf32> -> vector<8x128xf32>
    %c0_19 = arith.constant 0 : index
    %c0_20 = arith.constant 0 : index
    %32 = vector.load %arg8[%c0_19, %c0_20] : memref<1x128xf32, #tpu.memory_space<vmem>>, vector<1x128xf32>
    %33 = vector.broadcast %32 : vector<1x128xf32> to vector<8x128xf32>
    %34 = arith.addf %31, %33 : vector<8x128xf32>
    %c0_21 = arith.constant 0 : index
    %c0_22 = arith.constant 0 : index
    %35 = vector.load %arg2[%c0_21, %c0_22] : memref<8x128xf32, #tpu.memory_space<vmem>>, vector<8x128xf32>
    %36 = arith.mulf %34, %35 : vector<8x128xf32>
    %cst_23 = arith.constant dense<0.000000e+00> : vector<8xf32>
    %37 = vector.multi_reduction <add>, %36, %cst_23 [1] : vector<8x128xf32> to vector<8xf32>
    %38 = vector.shape_cast %37 : vector<8xf32> to vector<8x1xf32>
    %cst_24 = arith.constant 0.000000e+00 : f32
    %39 = vector.broadcast %cst_24 : f32 to vector<8x1xf32>
    %40 = arith.subf %39, %38 : vector<8x1xf32>
    %41 = math.exp %40 : vector<8x1xf32>
    %cst_25 = arith.constant 1.000000e+00 : f32
    %42 = vector.broadcast %cst_25 : f32 to vector<8x1xf32>
    %43 = arith.addf %42, %41 : vector<8x1xf32>
    %44 = tpu.reciprocal %43 {approx = true} : vector<8x1xf32> -> vector<8x1xf32>
    %45 = tpu.iota {dimensions = array<i32: 1>} : vector<8x128xi32>
    %c8_i32 = arith.constant 8 : i32
    %46 = vector.broadcast %c8_i32 : i32 to vector<8x128xi32>
    %47 = arith.cmpi eq, %45, %46 : vector<8x128xi32>
    %48 = vector.shape_cast %44 : vector<8x1xf32> to vector<8x1xf32>
    %49 = vector.broadcast %48 : vector<8x1xf32> to vector<8x128xf32>
    %50 = arith.select %47, %49, %34 : vector<8x128xi1>, vector<8x128xf32>
    %c0_26 = arith.constant 0 : index
    %c0_27 = arith.constant 0 : index
    %51 = vector.load %arg9[%c0_26, %c0_27] : memref<8x128xf32, #tpu.memory_space<vmem>>, vector<8x128xf32>
    tpu.vector_store %arg9[%c0_26, %c0_27], %50 {strides = array<i32>} : memref<8x128xf32, #tpu.memory_space<vmem>>, vector<8x128xf32>,
    return
  }
  func.func @transform_0(%arg0: i32) -> (i32, i32) {
    %c0_i32 = arith.constant 0 : i32
    %c0_i32_0 = arith.constant 0 : i32
    return %arg0, %c0_i32 : i32, i32
  }
  func.func @transform_1(%arg0: i32) -> (i32, i32) {
    %c0_i32 = arith.constant 0 : i32
    %c0_i32_0 = arith.constant 0 : i32
    return %arg0, %c0_i32 : i32, i32
  }
  func.func @transform_2(%arg0: i32) -> (i32, i32) {
    %c0_i32 = arith.constant 0 : i32
    %c0_i32_0 = arith.constant 0 : i32
    %c0_i32_1 = arith.constant 0 : i32
    return %c0_i32, %c0_i32_0 : i32, i32
  }
  func.func @transform_3(%arg0: i32) -> (i32, i32) {
    %c0_i32 = arith.constant 0 : i32
    %c0_i32_0 = arith.constant 0 : i32
    %c0_i32_1 = arith.constant 0 : i32
    return %c0_i32, %c0_i32_0 : i32, i32
  }
  func.func @transform_4(%arg0: i32) -> (i32, i32) {
    %c0_i32 = arith.constant 0 : i32
    %c0_i32_0 = arith.constant 0 : i32
    %c0_i32_1 = arith.constant 0 : i32
    return %c0_i32, %c0_i32_0 : i32, i32
  }
  func.func @transform_5(%arg0: i32) -> (i32, i32) {
    %c0_i32 = arith.constant 0 : i32
    %c0_i32_0 = arith.constant 0 : i32
    %c0_i32_1 = arith.constant 0 : i32
    return %c0_i32, %c0_i32_0 : i32, i32
  }
  func.func @transform_6(%arg0: i32) -> (i32, i32) {
    %c0_i32 = arith.constant 0 : i32
    %c0_i32_0 = arith.constant 0 : i32
    %c0_i32_1 = arith.constant 0 : i32
    return %c0_i32, %c0_i32_0 : i32, i32
  }
  func.func @transform_7(%arg0: i32) -> (i32, i32) {
    %c0_i32 = arith.constant 0 : i32
    %c0_i32_0 = arith.constant 0 : i32
    %c0_i32_1 = arith.constant 0 : i32
    return %c0_i32, %c0_i32_0 : i32, i32
  }
  func.func @transform_8(%arg0: i32) -> (i32, i32) {
    %c0_i32 = arith.constant 0 : i32
    %c0_i32_0 = arith.constant 0 : i32
    return %arg0, %c0_i32 : i32, i32
  }
}

</mosaic_0001>

<bundles_post_ra>
// kernel: tpu_custom_call.1
= control target key start
LH: loop header
LB: loop body
LE: loop exit
PB: predicated region body
PF: predicated region fallthrough
CT: control target
= control target key end

     0   :  { %13 = vsyncpa [#allocation3], 0  ;;  %s635_s0 = inlined_call_operand.hbm [shape: f32[8,16], index: 0, kind: input, shape index: {}]   ;;  %s636_s1 = inlined_call_operand.hbm [shape: f32[8,128], index: 1, kind: input, shape index: {}]   ;;  %s637_s2 = inlined_call_operand.hbm [shape: bf16[16,32], index: 2, kind: input, shape index: {}]   ;;  %s638_s3 = inlined_call_operand.vmem [shape: f32[1,32], index: 3, kind: input, shape index: {}]   ;;  %s639_s4 = inlined_call_operand.hbm [shape: bf16[32,32], index: 4, kind: input, shape index: {}]   ;;  %s640_s5 = inlined_call_operand.vmem [shape: f32[1,32], index: 5, kind: input, shape index: {}]   ;;  %s641_s6 = inlined_call_operand.vmem [shape: bf16[32,128], index: 6, kind: input, shape index: {}]   ;;  %s642_s7 = inlined_call_operand.vmem [shape: f32[1,128], index: 7, kind: input, shape index: {}]   ;;  %s643_s8 = inlined_call_operand.hbm [shape: f32[8,128], index: 8, kind: output, shape index: {}]  }
   0x1   :  { %14 = vsyncpa [#allocation6], 0 }
   0x2   :  { %15 = vsyncpa [#allocation9], 0 }
   0x3   :  { %16 = vsyncpa [#allocation4], 0  ;;  %s504_s27 = smov [#allocation5]   ;;  %s505_s29 = smov [#allocation2]  }
   0x4   :  { %s33_s28 = sshll.u32 %s504_s27, 4  ;;  %s23_s30 = sshll.u32 %s505_s29, 4  ;;  %s34_s28 = int_to_ptr.vmem [resolvable:$true] %s33_s28  ;;  %s24_s30 = int_to_ptr.vmem [resolvable:$true] %s23_s30 }
   0x5   :  { %s386_s11 = scalar_lea.hbm %s636_s1, 128 }
   0x6   :  { %p387_p0 = scmp.ne.s32.totalorder %s636_s1, %s386_s11  ;;  %p390_p1 = scmp.lt.u32.totalorder %s386_s11, %s636_s1 }
   0x8   :  { %p392_p2 = pnand %p390_p1, %p387_p0 }
   0xa   :  { %395 = shalt.err (!%p392_p2)
}
   0xb   :  { %s396_s16 = scalar_lea.vmem %s34_s28, 128  ;;  %p401_p4 = scmp.lt.s32.totalorder %s34_s28, %s34_s28 }
   0xc   :  { %p397_p3 = scmp.ne.s32.totalorder %s34_s28, %s396_s16  ;;  %p402_p5 = scmp.lt.s32.totalorder %s396_s16, %s396_s16 }
   0xe   :  { %p403_p6 = por %p402_p5, %p401_p4 }
  0x10   :  { %p404_p7 = pnand %p403_p6, %p397_p3 }
  0x12   :  { %407 = shalt.err (!%p404_p7)
}
  0x13   :  { %36 = dma.hbm_to_vmem [thread:$0]  %s636_s1, 128, %s34_s28, [#allocation6]  }
  0x14   :  { %s408_s21 = scalar_lea.hbm %s635_s0, 128 }
  0x15   :  { %p409_p8 = scmp.ne.s32.totalorder %s635_s0, %s408_s21  ;;  %p412_p9 = scmp.lt.u32.totalorder %s408_s21, %s635_s0 }
  0x17   :  { %p414_p10 = pnand %p412_p9, %p409_p8 }
  0x19   :  { %417 = shalt.err (!%p414_p10)
}
  0x1a   :  { %s418_s26 = scalar_lea.vmem %s24_s30, 128  ;;  %p423_p12 = scmp.lt.s32.totalorder %s24_s30, %s24_s30 }
  0x1b   :  { %p419_p11 = scmp.ne.s32.totalorder %s24_s30, %s418_s26  ;;  %p424_p13 = scmp.lt.s32.totalorder %s418_s26, %s418_s26 }
  0x1d   :  { %p425_p0 = por %p424_p13, %p423_p12 }
  0x1f   :  { %p426_p1 = pnand %p425_p0, %p419_p11 }
  0x21   :  { %429 = shalt.err (!%p426_p1)
}
  0x22   :  { %26 = dma.hbm_to_vmem [thread:$0]  %s635_s0, 128, %s24_s30, [#allocation3]  }
  0x23   :  { %s506_s28 = smov [#allocation7]   ;;  %s430_s11 = scalar_lea.hbm %s637_s2, 128 }
  0x24   :  { %s42_s29 = sshll.u32 %s506_s28, 4  ;;  %p431_p2 = scmp.ne.s32.totalorder %s637_s2, %s430_s11  ;;  %s43_s29 = int_to_ptr.vmem [resolvable:$true] %s42_s29 }
  0x25   :  { %p434_p3 = scmp.lt.u32.totalorder %s430_s11, %s637_s2 }
  0x27   :  { %p436_p4 = pnand %p434_p3, %p431_p2 }
  0x29   :  { %439 = shalt.err (!%p436_p4)
}
  0x2a   :  { %s440_s16 = scalar_lea.vmem %s43_s29, 128  ;;  %p445_p6 = scmp.lt.s32.totalorder %s43_s29, %s43_s29 }
  0x2b   :  { %p441_p5 = scmp.ne.s32.totalorder %s43_s29, %s440_s16  ;;  %p446_p7 = scmp.lt.s32.totalorder %s440_s16, %s440_s16 }
  0x2d   :  { %p447_p8 = por %p446_p7, %p445_p6 }
  0x2f   :  { %p448_p9 = pnand %p447_p8, %p441_p5 }
  0x31   :  { %451 = shalt.err (!%p448_p9)
}
  0x32   :  { %s507_s0 = smov 64   ;;  %s508_s30 = smov 4  }
  0x33   :  { %48 = dma.hbm_to_vmem [thread:$0]  %s637_s2, 128, %s43_s29, [#allocation6], %s507_s0, %s507_s0, %s508_s30  }
  0x34   :  { %s509_s19 = smov [#allocation8]   ;;  %s452_s23 = scalar_lea.hbm %s639_s4, 256 }
  0x35   :  { %s56_s20 = sshll.u32 %s509_s19, 4  ;;  %p453_p10 = scmp.ne.s32.totalorder %s639_s4, %s452_s23  ;;  %s57_s20 = int_to_ptr.vmem [resolvable:$true] %s56_s20 }
  0x36   :  { %p456_p11 = scmp.lt.u32.totalorder %s452_s23, %s639_s4 }
  0x38   :  { %p458_p12 = pnand %p456_p11, %p453_p10 }
  0x3a   :  { %461 = shalt.err (!%p458_p12)
}
  0x3b   :  { %s462_s27 = scalar_lea.vmem %s57_s20, 256  ;;  %p467_p0 = scmp.lt.s32.totalorder %s57_s20, %s57_s20 }
  0x3c   :  { %p463_p13 = scmp.ne.s32.totalorder %s57_s20, %s462_s27  ;;  %p468_p1 = scmp.lt.s32.totalorder %s462_s27, %s462_s27 }
  0x3e   :  { %p469_p2 = por %p468_p1, %p467_p0 }
  0x40   :  { %p470_p3 = pnand %p469_p2, %p463_p13 }
  0x42   :  { %473 = shalt.err (!%p470_p3)
}
  0x43   :  { %62 = dma.hbm_to_vmem [thread:$0]  %s639_s4, 256, %s57_s20, [#allocation9], %s507_s0, %s507_s0, %s508_s30  }
  0x44   :  { %496 = dma.done.wait [#allocation3], 128  }
  0x45   :  { %497 = vsyncadd [#allocation3], 4294967168 }
  0x46   :  { %498 = dma.done.wait [#allocation6], 256  }
  0x47   :  { %499 = vsyncadd [#allocation6], 4294967040 }
  0x48   :  { %500 = dma.done.wait [#allocation9], 256  }
  0x49   :  { %501 = vsyncadd [#allocation9], 4294967040  ;;  %v510_v0 = vmov 0.0   ;;  %vm511_vm0 = vmmov 0   ;;  %v373_v1 = vld [vmem:[#allocation7] sm:$0xff]   ;;  %v82_v2 = vld [vmem:[#allocation2] sm:$0xff]  ;;  %v299_v45 = vlaneseq }
  0x4a   :  { %342 = vmatprep.subr.bf16.mxu0 %v510_v0  ;;  %344 = vmatprep.mubr.msk.bf16.mxu0 %vm511_vm0, %v510_v0  ;;  %vm99_vm1 = vcmask 130048   ;;  %v83_v3 = vpack.c.bf16 %v82_v2, %v82_v2  ;;  %v374_v4 = vld [vmem:[#allocation8] sm:$0xff]   ;;  %v375_v5 = vld [vmem:[#allocation8 + $0x8] sm:$0xff]   ;;  %v321_v6 = vld [vmem:[%s638_s3] ss:$0 sm:$0xff]  ;;  %vm173_vm3 = vcmask 261120  }
  0x4b   :  { %348 = vmatprep.subr.bf16.mxu1 %v510_v0  ;;  %352 = vmatprep.mubr.msk.bf16.mxu1 %vm511_vm0, %v510_v0  ;;  %v376_v18 = vld [vmem:[%s641_s6] sm:$0xff]   ;;  %v377_v19 = vld [vmem:[%s641_s6 + $0x8] sm:$0xff]   ;;  %v290_v34 = vld [vmem:[#allocation5] sm:$0xff]  ;;  %v300_v46 = vand.u32 127, %v299_v45 }
  0x4c   :  { %343 = vmatpush3.bf16.msra.mxu0 %v373_v1  ;;  %349 = vmatpush3.bf16.msra.mxu1 %v374_v4  ;;  %v325_v20 = vld [vmem:[%s640_s5] ss:$0 sm:$0xff]  ;;  %s512_s5 = smov [#allocation10]  }
  0x4d   :  { %356 = vmatprep.subr.bf16.mxu0 %v510_v0  ;;  %350 = vmatprep.subr.bf16.mxu1 %v510_v0  ;;  %v330_v32 = vld [vmem:[%s642_s7] ss:$0 sm:$0xff]  ;;  %s310_s15 = sshll.u32 %s512_s5, 4  ;;  %vm301_vm5 = vcmp.eq.s32.totalorder %v300_v46, 8  ;;  %s311_s15 = int_to_ptr.vmem [resolvable:$true] %s310_s15 }
  0x4e   :  { %s474_s7 = scalar_lea.vmem %s311_s15, 128  ;;  %p479_p5 = scmp.lt.s32.totalorder %s311_s15, %s311_s15 }
  0x4f   :  { %345 = vmatmul.mubr.msk.bf16.vlgmr.msra.gmra.mrb[0].mxu0 %vm99_vm1, %v83_v3  ;;  %p475_p4 = scmp.ne.s32.totalorder %s311_s15, %s474_s7  ;;  %p480_p6 = scmp.lt.s32.totalorder %s474_s7, %s474_s7 }
  0x50   :  { %360 = vmatprep.mubr.msk.bf16.mxu0 %vm511_vm0, %v510_v0  ;;  %351 = vmatpush3.bf16.msra.mxu1 %v375_v5 }
  0x51   :  { %357 = vmatpush3.bf16.msra.mxu0 %v376_v18  ;;  %p481_p7 = por %p480_p6, %p479_p5 }
  0x52   :  { %358 = vmatprep.subr.bf16.mxu0 %v510_v0 }
  0x53   :  { %p482_p8 = pnand %p481_p7, %p475_p4 }
  0x55   :  { %359 = vmatpush3.bf16.msra.mxu0 %v377_v19 }
 0x122   :  { %v137_v7 = vpop.f32.mrb[0].mxu0 }
 0x123   :  { %v138_v8 = vadd.f32 %v321_v6, %v137_v7  ;;  %v346_v9 = vpop.f32.mrb[1].mxu0 }
 0x124   :  { %v140_v10 = vpop.f32.mrb[2].mxu0 }
 0x125   :  { %v144_v11 = vmin.f32 %v138_v8, 0.0  ;;  %v347_v12 = vpop.f32.mrb[3].mxu0  ;;  %vm143_vm2 = vcmp.gt.f32.partialorder %v138_v8, 0.0 }
 0x127   :  { %v145_v13 = vmul.f32 1.442695, %v144_v11 }
 0x129   :  { %378 = vpow2.f32 %v145_v13 }
 0x133   :  { %v379_v14 = vpop.eup %378 }
 0x134   :  { %v324_v15 = vadd.f32 -1.0, %v379_v14 }
 0x136   :  { %v148_v16 = vsel %vm143_vm2, %v138_v8, %v324_v15 }
 0x137   :  { %v149_v17 = vpack.c.bf16 %v148_v16, %v148_v16 }
 0x139   :  { %353 = vmatmul.mubr.msk.bf16.vlgmr.msra.gmra.mrb[0].mxu1 %vm173_vm3, %v149_v17 }
 0x20c   :  { %v211_v21 = vpop.f32.mrb[0].mxu1 }
 0x20d   :  { %v212_v22 = vadd.f32 %v325_v20, %v211_v21  ;;  %v354_v23 = vpop.f32.mrb[1].mxu1 }
 0x20e   :  { %v214_v24 = vpop.f32.mrb[2].mxu1 }
 0x20f   :  { %v218_v25 = vmin.f32 %v212_v22, 0.0  ;;  %v355_v26 = vpop.f32.mrb[3].mxu1  ;;  %vm217_vm4 = vcmp.gt.f32.partialorder %v212_v22, 0.0 }
 0x211   :  { %v219_v27 = vmul.f32 1.442695, %v218_v25 }
 0x213   :  { %380 = vpow2.f32 %v219_v27 }
 0x21d   :  { %v381_v28 = vpop.eup %380 }
 0x21e   :  { %v329_v29 = vadd.f32 -1.0, %v381_v28 }
 0x220   :  { %v222_v30 = vsel %vm217_vm4, %v212_v22, %v329_v29 }
 0x221   :  { %v223_v31 = vpack.c.bf16 %v222_v30, %v222_v30 }
 0x223   :  { %361 = vmatmul.mubr.msk.bf16.vlgmr.msra.gmra.mrb[4].mxu0 %vm173_vm3, %v223_v31 }
 0x2f6   :  { %v284_v33 = vpop.f32.mrb[4].mxu0 }
 0x2f7   :  { %v285_v35 = vadd.f32 %v330_v32, %v284_v33  ;;  %v362_v36 = vpop.f32.mrb[5].mxu0 }
 0x2f8   :  { %v287_v37 = vpop.f32.mrb[6].mxu0 }
 0x2f9   :  { %v363_v38 = vpop.f32.mrb[7].mxu0  ;;  %v291_v39 = vmul.f32 %v290_v34, %v285_v35 }
 0x2fb   :  { %292 = vadd.xlane.f32.xlu0 %v291_v39 }
 0x388   :  { %v293_v40 = vpop.xlane.xlu0 %292 }
 0x389   :  { %v294_v41 = vsub.f32 0.0, %v293_v40 }
 0x38b   :  { %v295_v42 = vmul.f32 1.442695, %v294_v41 }
 0x38d   :  { %382 = vpow2.f32 %v295_v42 }
 0x397   :  { %v383_v43 = vpop.eup %382 }
 0x398   :  { %v297_v44 = vadd.f32 1.0, %v383_v43 }
 0x39a   :  { %384 = vrcp.f32 %v297_v44 }
 0x3a4   :  { %v385_v47 = vpop.eup %384 }
 0x3a5   :  { %v302_v48 = vsel %vm301_vm5, %v385_v47, %v285_v35 }
 0x3a6   :  { %303 = vst [vmem:[#allocation10] sm:$0xff] %v302_v48 }
 0x3a7   :  { %485 = shalt.err (!%p482_p8)
}
 0x3a8   :  { %s486_s30 = scalar_lea.hbm %s643_s8, 128 }
 0x3a9   :  { %p487_p9 = scmp.ne.s32.totalorder %s643_s8, %s486_s30  ;;  %p490_p10 = scmp.lt.u32.totalorder %s486_s30, %s643_s8 }
 0x3ab   :  { %p492_p11 = pnand %p490_p10, %p487_p9 }
 0x3ad   :  { %495 = shalt.err (!%p492_p11)
}
 0x3ae   :  { %313 = dma.vmem_to_hbm [thread:$0]  %s311_s15, 128, %s643_s8, [#allocation4]  }
 0x3af   :  { %502 = dma.done.wait [#allocation4], 128  }
 0x3b0   :  { %503 = vsyncadd [#allocation4], 4294967168 }
 0x3b1   :  { %317 = vsyncpa [#allocation3], 1 }
 0x3b2   :  { %318 = vsyncpa [#allocation6], 1 }
 0x3b3   :  { %319 = vsyncpa [#allocation9], 1 }
 0x3b4   :  { %320 = vsyncpa [#allocation4], 1 }

</bundles_post_ra>
